<compile_context>
chip_gen: v7x
topology: tpu7x:2x2x1
jax: 0.10.0
libtpu: 0.0.40
codegen_flags: <defaults>
</compile_context>

<pallas_src>
import functools

import jax
import jax.numpy as jnp
from jax.experimental import pallas as pl
from jax.experimental.pallas import tpu as pltpu


def channel_attention_kernel(x_ref, w1_ref, w2_ref, o_ref,
                             sum_acc, max_acc, *, hw_total, tile_hw):
    """x_ref: (TB, C, TILE_HW); w1_ref: (C, Cr); w2_ref: (Cr, C); o_ref: (TB, C).

    Grid = (batch_blocks, hw_tiles); HW is the (last, 'arbitrary') reduction
    axis and the output block is resident across it.
    """
    k = pl.program_id(1)
    nk = pl.num_programs(1)

    # --- init accumulators on the first HW tile ---------------------------
    @pl.when(k == 0)
    def _init():
        sum_acc[...] = jnp.zeros_like(sum_acc)
        max_acc[...] = jnp.full_like(max_acc, -jnp.inf)   # max must start at -inf

    def _accumulate(x_sum, x_max):
        sum_acc[...] = sum_acc[...] + jnp.sum(x_sum, axis=-1, dtype=jnp.float32)
        max_acc[...] = jnp.maximum(max_acc[...],
                                   jnp.max(x_max, axis=-1).astype(jnp.float32))

    has_remainder = (hw_total % tile_hw) != 0

    if not has_remainder:
        # Common case: tiles cover HW exactly -> no masking anywhere.
        x = x_ref[...]
        _accumulate(x, x)
    else:
        # Mask only on the single overhanging last tile; all other tiles take
        # the unmasked fast path (no iota / compare / select in the hot loop).
        @pl.when(k < nk - 1)
        def _full_tile():
            x = x_ref[...]
            _accumulate(x, x)

        @pl.when(k == nk - 1)
        def _last_tile():
            x = x_ref[...]
            pos = k * tile_hw + jax.lax.broadcasted_iota(
                jnp.int32, (1, 1, tile_hw), 2)            # (1,1,TILE_HW), broadcast
            valid = pos < hw_total
            _accumulate(jnp.where(valid, x, 0.0),
                        jnp.where(valid, x, -jnp.inf))

    # --- finalize on the last HW tile: fused FCs + sigmoid -----------------
    @pl.when(k == nk - 1)
    def _finalize():
        avg = sum_acc[...] * (1.0 / float(hw_total))      # (TB, C) f32
        mx = max_acc[...]                                 # (TB, C) f32

        w1 = w1_ref[...].astype(jnp.float32)              # (C, Cr)
        w2 = w2_ref[...].astype(jnp.float32)              # (Cr, C)

        # relu(avg@W1)@W2 + relu(mx@W1)@W2 == (relu(avg@W1)+relu(mx@W1))@W2
        h = (jnp.maximum(jnp.dot(avg, w1, preferred_element_type=jnp.float32), 0.0)
             + jnp.maximum(jnp.dot(mx, w1, preferred_element_type=jnp.float32), 0.0))
        y = jnp.dot(h, w2, preferred_element_type=jnp.float32)   # (TB, C)

        o_ref[...] = jax.nn.sigmoid(y).astype(o_ref.dtype)


def _vmem_budgets():
    """Derive the scoped-VMEM limit and x-block tile budget from hardware."""
    try:
        vmem_cap = int(pltpu.get_tpu_info().vmem_capacity_bytes)
    except Exception:
        vmem_cap = 64 * 1024 * 1024           # conservative (v7x per-TC size)
    # Keep double-buffered x blocks + weights + scratch comfortably under cap.
    vmem_limit = max(32 * 1024 * 1024,
                     min(vmem_cap - 8 * 1024 * 1024, 100 * 1024 * 1024))
    tile_budget = int(vmem_limit * 0.70)
    return vmem_limit, tile_budget


def _pick_batch_block(B):
    if B <= 8:
        return B                               # single block (full-dim is legal)
    if B < 16:
        return 8
    # 8-row-aligned blocks, at least 2 of them (keeps both v7x TensorCores
    # busy via the 'parallel' batch axis), capped at 32 rows.
    return max(8, min(32, (B // 2) // 8 * 8))


def _pick_hw_tile(tb, C, HW, dtype_size, tile_budget_bytes):
    """Largest useful lane tile.  Prefers tiles that divide HW exactly."""
    bytes_per_lane = 2 * tb * C * dtype_size          # double-buffered input block
    max_lanes = max(128, (tile_budget_bytes // max(1, bytes_per_lane)) // 128 * 128)
    if HW <= max_lanes:
        return HW                                     # single tile, full extent
    if HW % 128 == 0:
        # Largest 128-multiple divisor of HW within budget -> no masking ever.
        n128 = HW // 128
        cap128 = max_lanes // 128
        best = 1
        d = 1
        while d * d <= n128:
            if n128 % d == 0:
                for q in (d, n128 // d):
                    if q <= cap128 and q > best:
                        best = q
            d += 1
        if best * 2 >= cap128:                        # close enough to the cap
            return best * 128
    return max_lanes                                  # masked remainder tile


def channel_attention(x_nchw, w1_t, w2_t, *,
                      vmem_limit_bytes=None, tile_budget_bytes=None):
    """x_nchw: (B, C, H, W); w1_t: (C, C//16); w2_t: (C//16, C).

    Returns the sigmoid channel-attention map of shape (B, C, 1, 1), matching
    the PyTorch module's output (the module does NOT multiply back into x).
    """
    B, C, H, W = x_nchw.shape
    HW = H * W
    Cr = w1_t.shape[1]
    x_flat = x_nchw.reshape(B, C, HW)

    auto_limit, auto_budget = _vmem_budgets()
    if vmem_limit_bytes is None:
        vmem_limit_bytes = auto_limit
    if tile_budget_bytes is None:
        tile_budget_bytes = auto_budget

    dtype_size = jnp.dtype(x_nchw.dtype).itemsize
    TB = _pick_batch_block(B)
    # Guard: shrink TB if even a minimal 128-lane block would blow the budget.
    while TB > 8 and 2 * TB * C * 128 * dtype_size > tile_budget_bytes:
        TB = max(8, (TB // 2) // 8 * 8)
    TILE_HW = _pick_hw_tile(TB, C, HW, dtype_size, tile_budget_bytes)

    nb = pl.cdiv(B, TB)          # partial edge block allowed (TB multiple of 8)
    nk = pl.cdiv(HW, TILE_HW)

    kernel = functools.partial(
        channel_attention_kernel, hw_total=HW, tile_hw=TILE_HW)

    w_bytes = (C * Cr + Cr * C) * jnp.dtype(w1_t.dtype).itemsize
    cost = pl.CostEstimate(
        flops=2 * B * C * HW + 8 * B * C * Cr,        # reductions + fused FCs
        transcendentals=B * C,                        # sigmoid
        bytes_accessed=B * C * HW * dtype_size + w_bytes + B * C * dtype_size,
    )

    out = pl.pallas_call(
        kernel,
        out_shape=jax.ShapeDtypeStruct((B, C), x_nchw.dtype),
        grid_spec=pltpu.PrefetchScalarGridSpec(
            num_scalar_prefetch=0,
            grid=(nb, nk),                            # reduction (HW) axis last
            in_specs=[
                pl.BlockSpec((TB, C, TILE_HW), lambda b, k: (b, 0, k)),
                pl.BlockSpec((C, Cr), lambda b, k: (0, 0)),   # weights resident
                pl.BlockSpec((Cr, C), lambda b, k: (0, 0)),
            ],
            out_specs=pl.BlockSpec((TB, C), lambda b, k: (b, 0)),
            scratch_shapes=[
                pltpu.VMEM((TB, C), jnp.float32),     # running sum
                pltpu.VMEM((TB, C), jnp.float32),     # running max
            ],
        ),
        compiler_params=pltpu.CompilerParams(
            dimension_semantics=("parallel", "arbitrary"),
            vmem_limit_bytes=vmem_limit_bytes,
        ),
        cost_estimate=cost,
    )(x_flat, w1_t, w2_t)

    return out.reshape(B, C, 1, 1)


def reference(x_nchw, w1_t, w2_t):
    avg = jnp.mean(x_nchw, axis=(2, 3))
    mx = jnp.max(x_nchw, axis=(2, 3))
    a = jnp.maximum(avg @ w1_t, 0.0) @ w2_t
    m = jnp.maximum(mx @ w1_t, 0.0) @ w2_t
    return jax.nn.sigmoid(a + m).reshape(*x_nchw.shape[:2], 1, 1)


if __name__ == "__main__":
    key = jax.random.PRNGKey(0)
    k_x, k_w1, k_w2 = jax.random.split(key, 3)

    B, C, H, W = 2, 32, 16, 16          # in_planes=32 -> hidden = 32 // 16 = 2
    Cr = C // 16

    x = jax.random.normal(k_x, (B, C, H, W), dtype=jnp.float32)

    # PyTorch conv weight shapes are (Cr, C, 1, 1) for fc1 and (C, Cr, 1, 1)
    # for fc2; store transposed dense equivalents so y = x @ w_t matches
    # conv(x, w) with 1x1 kernels and no bias.
    w1 = jax.random.normal(k_w1, (Cr, C), dtype=jnp.float32) * 0.1   # fc1 weight
    w2 = jax.random.normal(k_w2, (C, Cr), dtype=jnp.float32) * 0.1   # fc2 weight
    w1_t = w1.T   # (C, Cr)
    w2_t = w2.T   # (Cr, C)

    out = channel_attention(x, w1_t, w2_t)
    out = jax.block_until_ready(out)

    ref = reference(x, w1_t, w2_t)
    assert out.shape == (B, C, 1, 1)
    assert jnp.allclose(out, ref, atol=1e-5, rtol=1e-5), "mismatch vs reference"

    print("KERNEL_OK")
</pallas_src>

<mosaic_0001>
module attributes {stable_mosaic.version = 11 : i64} {
  func.func @channel_attention_kernel(%arg0: i32, %arg1: i32, %arg2: memref<2x32x256xf32, #tpu.memory_space<vmem>>, %arg3: memref<32x2xf32, #tpu.memory_space<vmem>>, %arg4: memref<2x32xf32, #tpu.memory_space<vmem>>, %arg5: memref<2x32xf32, #tpu.memory_space<vmem>>, %arg6: memref<2x32xf32, #tpu.memory_space<vmem>>, %arg7: memref<2x32xf32, #tpu.memory_space<vmem>>) attributes {dimension_semantics = [#tpu.dimension_semantics<parallel>, #tpu.dimension_semantics<arbitrary>], iteration_bounds = array<i64: 1, 1>, scalar_prefetch = 0 : i64, scratch_operands = 2 : i64, tpu.core_type = #tpu.core_type<tc>, window_params = [{transform_indices = @transform_0, window_bounds = array<i64: 2, 32, 256>}, {pipeline_mode = #tpu.pipeline_mode<synchronous>, transform_indices = @transform_1, window_bounds = array<i64: 32, 2>}, {pipeline_mode = #tpu.pipeline_mode<synchronous>, transform_indices = @transform_2, window_bounds = array<i64: 2, 32>}, {transform_indices = @transform_3, window_bounds = array<i64: 2, 32>}]} {
    %c0_i32 = arith.constant 0 : i32
    %0 = arith.cmpi eq, %arg1, %c0_i32 : i32
    %1 = arith.extui %0 : i1 to i32
    %c0_i32_0 = arith.constant 0 : i32
    %2 = arith.cmpi ne, %1, %c0_i32_0 : i32
    scf.if %2 {
      %cst_14 = arith.constant 0.000000e+00 : f32
      %15 = vector.broadcast %cst_14 : f32 to vector<2x32xf32>
      %c0_15 = arith.constant 0 : index
      %c0_16 = arith.constant 0 : index
      %16 = vector.load %arg6[%c0_15, %c0_16] : memref<2x32xf32, #tpu.memory_space<vmem>>, vector<2x32xf32>
      tpu.vector_store %arg6[%c0_15, %c0_16], %15 {strides = array<i32>} : memref<2x32xf32, #tpu.memory_space<vmem>>, vector<2x32xf32>,
      %cst_17 = arith.constant 0xFF800000 : f32
      %17 = vector.broadcast %cst_17 : f32 to vector<2x32xf32>
      %c0_18 = arith.constant 0 : index
      %c0_19 = arith.constant 0 : index
      %18 = vector.load %arg7[%c0_18, %c0_19] : memref<2x32xf32, #tpu.memory_space<vmem>>, vector<2x32xf32>
      tpu.vector_store %arg7[%c0_18, %c0_19], %17 {strides = array<i32>} : memref<2x32xf32, #tpu.memory_space<vmem>>, vector<2x32xf32>,
    } else {
    }
    %c0 = arith.constant 0 : index
    %c0_1 = arith.constant 0 : index
    %c0_2 = arith.constant 0 : index
    %3 = vector.load %arg2[%c0, %c0_1, %c0_2] : memref<2x32x256xf32, #tpu.memory_space<vmem>>, vector<2x32x256xf32>
    %c0_3 = arith.constant 0 : index
    %c0_4 = arith.constant 0 : index
    %4 = vector.load %arg6[%c0_3, %c0_4] : memref<2x32xf32, #tpu.memory_space<vmem>>, vector<2x32xf32>
    %cst = arith.constant dense<0.000000e+00> : vector<2x32xf32>
    %5 = vector.multi_reduction <add>, %3, %cst [2] : vector<2x32x256xf32> to vector<2x32xf32>
    %6 = arith.addf %4, %5 : vector<2x32xf32>
    %c0_5 = arith.constant 0 : index
    %c0_6 = arith.constant 0 : index
    %7 = vector.load %arg6[%c0_5, %c0_6] : memref<2x32xf32, #tpu.memory_space<vmem>>, vector<2x32xf32>
    tpu.vector_store %arg6[%c0_5, %c0_6], %6 {strides = array<i32>} : memref<2x32xf32, #tpu.memory_space<vmem>>, vector<2x32xf32>,
    %c0_7 = arith.constant 0 : index
    %c0_8 = arith.constant 0 : index
    %8 = vector.load %arg7[%c0_7, %c0_8] : memref<2x32xf32, #tpu.memory_space<vmem>>, vector<2x32xf32>
    %cst_9 = arith.constant dense<0xFF800000> : vector<2x32xf32>
    %9 = vector.multi_reduction <maximumf>, %3, %cst_9 [2] : vector<2x32x256xf32> to vector<2x32xf32>
    %10 = arith.maximumf %8, %9 : vector<2x32xf32>
    %c0_10 = arith.constant 0 : index
    %c0_11 = arith.constant 0 : index
    %11 = vector.load %arg7[%c0_10, %c0_11] : memref<2x32xf32, #tpu.memory_space<vmem>>, vector<2x32xf32>
    tpu.vector_store %arg7[%c0_10, %c0_11], %10 {strides = array<i32>} : memref<2x32xf32, #tpu.memory_space<vmem>>, vector<2x32xf32>,
    %c0_i32_12 = arith.constant 0 : i32
    %12 = arith.cmpi eq, %arg1, %c0_i32_12 : i32
    %13 = arith.extui %12 : i1 to i32
    %c0_i32_13 = arith.constant 0 : i32
    %14 = arith.cmpi ne, %13, %c0_i32_13 : i32
    scf.if %14 {
      %c0_14 = arith.constant 0 : index
      %c0_15 = arith.constant 0 : index
      %15 = vector.load %arg6[%c0_14, %c0_15] : memref<2x32xf32, #tpu.memory_space<vmem>>, vector<2x32xf32>
      %cst_16 = arith.constant 3.906250e-03 : f32
      %16 = vector.broadcast %cst_16 : f32 to vector<2x32xf32>
      %17 = arith.mulf %15, %16 : vector<2x32xf32>
      %c0_17 = arith.constant 0 : index
      %c0_18 = arith.constant 0 : index
      %18 = vector.load %arg7[%c0_17, %c0_18] : memref<2x32xf32, #tpu.memory_space<vmem>>, vector<2x32xf32>
      %c0_19 = arith.constant 0 : index
      %c0_20 = arith.constant 0 : index
      %19 = vector.load %arg3[%c0_19, %c0_20] : memref<32x2xf32, #tpu.memory_space<vmem>>, vector<32x2xf32>
      %c0_21 = arith.constant 0 : index
      %c0_22 = arith.constant 0 : index
      %20 = vector.load %arg4[%c0_21, %c0_22] : memref<2x32xf32, #tpu.memory_space<vmem>>, vector<2x32xf32>
      %cst_23 = arith.constant dense<0.000000e+00> : vector<2x2xf32>
      %21 = tpu.matmul %17, %19, %cst_23 {dimension_numbers = #tpu.dot_dimension_numbers<[1], [0], [0], [1], [0, 0, 1, 1], [], []>} : vector<2x32xf32>, vector<32x2xf32>, vector<2x2xf32> -> vector<2x2xf32>
      %cst_24 = arith.constant 0.000000e+00 : f32
      %22 = vector.broadcast %cst_24 : f32 to vector<2x2xf32>
      %23 = arith.maximumf %21, %22 : vector<2x2xf32>
      %cst_25 = arith.constant dense<0.000000e+00> : vector<2x2xf32>
      %24 = tpu.matmul %18, %19, %cst_25 {dimension_numbers = #tpu.dot_dimension_numbers<[1], [0], [0], [1], [0, 0, 1, 1], [], []>} : vector<2x32xf32>, vector<32x2xf32>, vector<2x2xf32> -> vector<2x2xf32>
      %cst_26 = arith.constant 0.000000e+00 : f32
      %25 = vector.broadcast %cst_26 : f32 to vector<2x2xf32>
      %26 = arith.maximumf %24, %25 : vector<2x2xf32>
      %27 = arith.addf %23, %26 : vector<2x2xf32>
      %cst_27 = arith.constant dense<0.000000e+00> : vector<2x32xf32>
      %28 = tpu.matmul %27, %20, %cst_27 {dimension_numbers = #tpu.dot_dimension_numbers<[1], [0], [0], [1], [0, 0, 1, 1], [], []>} : vector<2x2xf32>, vector<2x32xf32>, vector<2x32xf32> -> vector<2x32xf32>
      %29 = arith.negf %28 : vector<2x32xf32>
      %30 = math.exp %29 : vector<2x32xf32>
      %cst_28 = arith.constant 1.000000e+00 : f32
      %31 = vector.broadcast %cst_28 : f32 to vector<2x32xf32>
      %32 = arith.addf %31, %30 : vector<2x32xf32>
      %33 = arith.divf %31, %32 : vector<2x32xf32>
      %c0_29 = arith.constant 0 : index
      %c0_30 = arith.constant 0 : index
      %34 = vector.load %arg5[%c0_29, %c0_30] : memref<2x32xf32, #tpu.memory_space<vmem>>, vector<2x32xf32>
      tpu.vector_store %arg5[%c0_29, %c0_30], %33 {strides = array<i32>} : memref<2x32xf32, #tpu.memory_space<vmem>>, vector<2x32xf32>,
    } else {
    }
    return
  }
  func.func @transform_0(%arg0: i32, %arg1: i32) -> (i32, i32, i32) {
    %c0_i32 = arith.constant 0 : i32
    %c0_i32_0 = arith.constant 0 : i32
    return %arg0, %c0_i32, %arg1 : i32, i32, i32
  }
  func.func @transform_1(%arg0: i32, %arg1: i32) -> (i32, i32) {
    %c0_i32 = arith.constant 0 : i32
    %c0_i32_0 = arith.constant 0 : i32
    %c0_i32_1 = arith.constant 0 : i32
    return %c0_i32, %c0_i32_0 : i32, i32
  }
  func.func @transform_2(%arg0: i32, %arg1: i32) -> (i32, i32) {
    %c0_i32 = arith.constant 0 : i32
    %c0_i32_0 = arith.constant 0 : i32
    %c0_i32_1 = arith.constant 0 : i32
    return %c0_i32, %c0_i32_0 : i32, i32
  }
  func.func @transform_3(%arg0: i32, %arg1: i32) -> (i32, i32) {
    %c0_i32 = arith.constant 0 : i32
    %c0_i32_0 = arith.constant 0 : i32
    return %arg0, %c0_i32 : i32, i32
  }
}

</mosaic_0001>

<bundles_post_ra>
// kernel: tpu_custom_call.1
= control target key start
LH: loop header
LB: loop body
LE: loop exit
PB: predicated region body
PF: predicated region fallthrough
CT: control target
= control target key end

     0   :  { %8 = vsyncpa [#allocation5], 0  ;;  %s685_s0 = inlined_call_operand.hbm [shape: f32[2,32,256], index: 0, kind: input, shape index: {}]   ;;  %s686_s1 = inlined_call_operand.vmem [shape: f32[32,2], index: 1, kind: input, shape index: {}]   ;;  %s687_s2 = inlined_call_operand.vmem [shape: f32[2,32], index: 2, kind: input, shape index: {}]   ;;  %s688_s3 = inlined_call_operand.hbm [shape: f32[2,32], index: 3, kind: output, shape index: {}]  }
   0x1   :  { %9 = vsyncpa [#allocation6], 0  ;;  %s589_s12 = smov [#allocation4]   ;;  %s541_s16 = scalar_lea.hbm %s685_s0, 2048 }
   0x2   :  { %s15_s13 = sshll.u32 %s589_s12, 4  ;;  %p542_p0 = scmp.ne.s32.totalorder %s685_s0, %s541_s16  ;;  %s16_s13 = int_to_ptr.vmem [resolvable:$true] %s15_s13 }
   0x3   :  { %p545_p1 = scmp.lt.u32.totalorder %s541_s16, %s685_s0 }
   0x5   :  { %p547_p2 = pnand %p545_p1, %p542_p0 }
   0x7   :  { %550 = shalt.err (!%p547_p2)
}
   0x8   :  { %s551_s21 = scalar_lea.vmem %s16_s13, 2048  ;;  %p556_p4 = scmp.lt.s32.totalorder %s16_s13, %s16_s13 }
   0x9   :  { %p552_p3 = scmp.ne.s32.totalorder %s16_s13, %s551_s21  ;;  %p557_p5 = scmp.lt.s32.totalorder %s551_s21, %s551_s21 }
   0xb   :  { %p558_p6 = por %p557_p5, %p556_p4 }
   0xd   :  { %p559_p7 = pnand %p558_p6, %p552_p3 }
   0xf   :  { %562 = shalt.err (!%p559_p7)
}
  0x10   :  { %s590_s22 = smov 256   ;;  %s591_s23 = smov 16  }
  0x11   :  { %21 = dma.hbm_to_vmem [thread:$0]  %s685_s0, 2048, %s16_s13, [#allocation5], %s590_s22, %s590_s22, %s591_s23  }
  0x12   :  { %585 = dma.done.wait [#allocation5], 2048  }
  0x13   :  { %586 = vsyncadd [#allocation5], 4294965248  ;;  %v44_v0 = vld [vmem:[#allocation4 + $0x40] sm:$0xff]  ;;  %v45_v1 = vld [vmem:[#allocation4 + $0x48] sm:$0xff]  ;;  %vm33_vm0 = vcmask 254976   ;;  %v592_v30 = vmov 0.0   ;;  %v85_v41 = vlaneseq }
  0x14   :  { %v36_v2 = vld [vmem:[#allocation4] sm:$0xff]  ;;  %v65_v3 = vadd.f32 %v45_v1, %v44_v0  ;;  %v37_v4 = vld [vmem:[#allocation4 + $0x8] sm:$0xff]  ;;  %v46_v5 = vld [vmem:[#allocation4 + $0x50] sm:$0xff]  ;;  %v150_v27 = vmax.f32 %v44_v0, %v45_v1  ;;  %34 = vst.msk [vmem:[#allocation2] sm:$0x3] %vm33_vm0, %v592_v30  ;;  %v593_v36 = vmov 0.0|0.0  }
  0x15   :  { %v47_v6 = vld [vmem:[#allocation4 + $0x58] sm:$0xff]  ;;  %v53_v7 = vadd.f32 %v37_v4, %v36_v2  ;;  %v38_v8 = vld [vmem:[#allocation4 + $0x10] sm:$0xff]  ;;  %v48_v12 = vld [vmem:[#allocation4 + $0x60] sm:$0xff]  ;;  %v138_v25 = vmax.f32 %v36_v2, %v37_v4  ;;  %517 = vmatprep.subr.bf16.mxu0 %v593_v36  ;;  %523 = vmatprep.subr.bf16.mxu1 %v593_v36  ;;  %v594_v40 = vmov -inf   ;;  %vm595_vm1 = vmmov 0   ;;  %s596_s7 = smov [#allocation7]  }
  0x16   :  { %v39_v9 = vld [vmem:[#allocation4 + $0x18] sm:$0xff]  ;;  %66 = vadd.xlane.f32.xlu1 %v65_v3  ;;  %v68_v10 = vadd.f32 %v47_v6, %v46_v5  ;;  %v49_v13 = vld [vmem:[#allocation4 + $0x68] sm:$0xff]  ;;  %v40_v14 = vld [vmem:[#allocation4 + $0x20] sm:$0xff]  ;;  %v153_v26 = vmax.f32 %v46_v5, %v47_v6  ;;  %35 = vst.msk [vmem:[#allocation3] sm:$0x3] %vm33_vm0, %v594_v40  ;;  %498 = vmatprep.mubr.msk.f32.mxu0 %vm595_vm1, %v592_v30  ;;  %v86_v42 = vand.u32 127, %v85_v41 }
  0x17   :  { %54 = vadd.xlane.f32.xlu0 %v53_v7  ;;  %v56_v11 = vadd.f32 %v39_v9, %v38_v8  ;;  %v41_v15 = vld [vmem:[#allocation4 + $0x28] sm:$0xff]  ;;  %v71_v16 = vadd.f32 %v49_v13, %v48_v12  ;;  %v50_v18 = vld [vmem:[#allocation4 + $0x70] sm:$0xff]  ;;  %v51_v19 = vld [vmem:[#allocation4 + $0x78] sm:$0xff]  ;;  %v141_v24 = vmax.f32 %v38_v8, %v39_v9  ;;  %v156_v28 = vmax.f32 %v48_v12, %v49_v13 }
  0x18   :  { %v59_v17 = vadd.f32 %v41_v15, %v40_v14  ;;  %v42_v20 = vld [vmem:[#allocation4 + $0x30] sm:$0xff]  ;;  %v43_v21 = vld [vmem:[#allocation4 + $0x38] sm:$0xff]  ;;  %v74_v22 = vadd.f32 %v51_v19, %v50_v18  ;;  %v144_v29 = vmax.f32 %v40_v14, %v41_v15  ;;  %v159_v31 = vmax.f32 %v50_v18, %v51_v19  ;;  %v219_v34 = vld [vmem:[%s686_s1 + $0x8] sm:$0xff]  ;;  %509 = vmatprep.mubr.msk.f32.mxu1 %vm595_vm1, %v592_v30 }
  0x19   :  { %v62_v23 = vadd.f32 %v43_v21, %v42_v20  ;;  %v147_v32 = vmax.f32 %v42_v20, %v43_v21  ;;  %v218_v33 = vld [vmem:[%s686_s1] sm:$0xff]  ;;  %v220_v37 = vld [vmem:[%s686_s1 + $0x10] sm:$0xff]  ;;  %v221_v38 = vld [vmem:[%s686_s1 + $0x18] sm:$0xff]  ;;  %v91_v45 = vadd.s32 4294967288, %v86_v42  ;;  %v98_v46 = vadd.s32 4294967280, %v86_v42 }
  0x1a   :  { %69 = vadd.xlane.f32.xlu1 %v68_v10  ;;  %v518_v35 = vpack.c.bf16 %v219_v34, %v218_v33  ;;  %v521_v39 = vpack.c.bf16 %v221_v38, %v220_v37  ;;  %v88_v47 = vshrl.u32 %v85_v41, 7  ;;  %v105_v51 = vadd.s32 4294967272, %v86_v42  ;;  %v222_v41 = vld [vmem:[%s687_s2] sm:$0x3]  ;;  %s464_s2 = sshll.u32 %s596_s7, 4  ;;  %s465_s2 = int_to_ptr.vmem [resolvable:$true] %s464_s2 }
  0x1b   :  { %57 = vadd.xlane.f32.xlu0 %v56_v11  ;;  %vm96_vm2 = vcmask 130112   ;;  %vm103_vm3 = vcmask 195712   ;;  %vm110_vm4 = vcmask 261312   ;;  %vm131_vm5 = vcmask 1041409   ;;  %v52_v8 = vld [vmem:[#allocation2] sm:$0x3]  ;;  %p568_p9 = scmp.lt.s32.totalorder %s465_s2, %s465_s2 }
  0x1c   :  { %519 = vmatpush3.bf16.msra.mxu0 %v518_v35  ;;  %525 = vmatpush3.bf16.msra.mxu1 %v518_v35  ;;  %v94_v49 = vsub.s32 %v91_v45, %v88_v47  ;;  %v101_v52 = vsub.s32 %v98_v46, %v88_v47  ;;  %v89_v53 = vsub.s32 %v86_v42, %v88_v47  ;;  %vm223_vm6 = vcmask 261120   ;;  %s563_s8 = scalar_lea.vmem %s465_s2, 32 }
  0x1d   :  { %520 = vmatprep.subr.bf16.mxu0 %v593_v36  ;;  %526 = vmatprep.subr.bf16.mxu1 %v593_v36  ;;  %v108_v57 = vsub.s32 %v105_v51, %v88_v47  ;;  %v137_v36 = vld [vmem:[#allocation3] sm:$0x3]  ;;  %vm377_vm7 = vcmask 1041408   ;;  %vm373_vm8 = vcmask 15360   ;;  %p564_p8 = scmp.ne.s32.totalorder %s465_s2, %s563_s8  ;;  %p569_p10 = scmp.lt.s32.totalorder %s563_s8, %s563_s8 }
  0x1e   :  { %72 = vadd.xlane.f32.xlu1 %v71_v16 }
  0x1f   :  { %60 = vadd.xlane.f32.xlu0 %v59_v17  ;;  %p570_p11 = por %p569_p10, %p568_p9 }
  0x20   :  { %522 = vmatpush3.bf16.msra.mxu0 %v521_v39  ;;  %528 = vmatpush3.bf16.msra.mxu1 %v521_v39 }
  0x21   :  { %512 = vmatprep.subr.mxu0 %v592_v30  ;;  %p571_p12 = pnand %p570_p11, %p564_p8 }
  0x22   :  { %75 = vadd.xlane.f32.xlu1 %v74_v22 }
  0x23   :  { %63 = vadd.xlane.f32.xlu0 %v62_v23 }
  0x26   :  { %142 = vmax.xlane.f32.xlu1 %v141_v24 }
  0x27   :  { %139 = vmax.xlane.f32.xlu0 %v138_v25 }
  0x2a   :  { %154 = vmax.xlane.f32.xlu1 %v153_v26 }
  0x2b   :  { %151 = vmax.xlane.f32.xlu0 %v150_v27 }
  0x2e   :  { %157 = vmax.xlane.f32.xlu1 %v156_v28 }
  0x2f   :  { %145 = vmax.xlane.f32.xlu0 %v144_v29 }
  0x32   :  { %160 = vmax.xlane.f32.xlu1 %v159_v31 }
  0x33   :  { %148 = vmax.xlane.f32.xlu0 %v147_v32 }
  0xa3   :  { %v67_v43 = vpop.xlane.xlu1 %66 }
  0xa4   :  { %v55_v44 = vpop.xlane.xlu0 %54  ;;  %v115_v60 = vrot.slane %v67_v43, %v89_v53 }
  0xa5   :  { %v90_v62 = vrot.slane %v55_v44, %v89_v53 }
  0xa7   :  { %v70_v48 = vpop.xlane.xlu1 %69 }
  0xa8   :  { %v58_v50 = vpop.xlane.xlu0 %57  ;;  %v119_v55 = vrot.slane %v70_v48, %v94_v49 }
  0xa9   :  { %v95_v58 = vrot.slane %v58_v50, %v94_v49 }
  0xaa   :  { %v120_v0 = vsel %vm96_vm2, %v119_v55, %v115_v60 }
  0xab   :  { %v73_v54 = vpop.xlane.xlu1 %72  ;;  %v97_v3 = vsel %vm96_vm2, %v95_v58, %v90_v62 }
  0xac   :  { %v61_v56 = vpop.xlane.xlu0 %60  ;;  %v124_v59 = vrot.slane %v73_v54, %v101_v52 }
  0xad   :  { %v102_v61 = vrot.slane %v61_v56, %v101_v52 }
  0xae   :  { %v125_v4 = vsel %vm103_vm3, %v124_v59, %v120_v0 }
  0xaf   :  { %v76_v63 = vpop.xlane.xlu1 %75  ;;  %v104_v6 = vsel %vm103_vm3, %v102_v61, %v97_v3 }
  0xb0   :  { %v129_v1 = vrot.slane %v76_v63, %v108_v57  ;;  %v64_v2 = vpop.xlane.xlu0 %63 }
  0xb1   :  { %v109_v5 = vrot.slane %v64_v2, %v108_v57 }
  0xb2   :  { %v130_v7 = vsel %vm110_vm4, %v129_v1, %v125_v4 }
  0xb3   :  { %v111_v9 = vsel %vm110_vm4, %v109_v5, %v104_v6  ;;  %v143_v10 = vpop.xlane.xlu1 %142 }
  0xb4   :  { %v132_v11 = vsel %vm131_vm5, %v130_v7, %v111_v9  ;;  %v140_v12 = vpop.xlane.xlu0 %139  ;;  %v177_v20 = vrot.slane %v143_v10, %v94_v49 }
  0xb5   :  { %v134_v13 = vadd.f32 %v132_v11, %v52_v8  ;;  %v173_v21 = vrot.slane %v140_v12, %v89_v53 }
  0xb7   :  { %v155_v14 = vpop.xlane.xlu1 %154  ;;  %136 = vst.msk [vmem:[#allocation2] sm:$0x3] %vm33_vm0, %v134_v13  ;;  %v178_v31 = vsel %vm96_vm2, %v177_v20, %v173_v21 }
  0xb8   :  { %v152_v15 = vpop.xlane.xlu0 %151  ;;  %v196_v17 = vrot.slane %v155_v14, %v94_v49 }
  0xb9   :  { %v192_v18 = vrot.slane %v152_v15, %v89_v53 }
  0xbb   :  { %v158_v16 = vpop.xlane.xlu1 %157  ;;  %v197_v27 = vsel %vm96_vm2, %v196_v17, %v192_v18 }
  0xbc   :  { %v146_v19 = vpop.xlane.xlu0 %145  ;;  %v201_v22 = vrot.slane %v158_v16, %v101_v52 }
  0xbd   :  { %v182_v23 = vrot.slane %v146_v19, %v101_v52 }
  0xbe   :  { %v215_v24 = vld [vmem:[#allocation2] sm:$0x3]  ;;  %v202_v32 = vsel %vm103_vm3, %v201_v22, %v197_v27 }
  0xbf   :  { %v161_v25 = vpop.xlane.xlu1 %160  ;;  %v216_v26 = vmul.f32 0.00390625, %v215_v24  ;;  %v183_v34 = vsel %vm103_vm3, %v182_v23, %v178_v31 }
  0xc0   :  { %v206_v28 = vrot.slane %v161_v25, %v108_v57  ;;  %v149_v29 = vpop.xlane.xlu0 %148 }
  0xc1   :  { %v187_v33 = vrot.slane %v149_v29, %v108_v57  ;;  %499 = vmatmul.mubr.msk.f32.vlgmr.msra.gmra.mrb[0].mxu0 %vm223_vm6, %v216_v26 }
  0xc2   :  { %v207_v35 = vsel %vm110_vm4, %v206_v28, %v202_v32  ;;  %514 = vmatprep.mubr.msk.f32.mxu0 %vm595_vm1, %v592_v30  ;;  %513 = vmatpush3.msk.msra.mxu0 %vm377_vm7, %v222_v41 }
  0xc3   :  { %v188_v37 = vsel %vm110_vm4, %v187_v33, %v183_v34 }
  0xc4   :  { %v208_v38 = vsel %vm131_vm5, %v207_v35, %v188_v37 }
  0xc5   :  { %v210_v39 = vmax.f32 %v137_v36, %v208_v38 }
  0xc7   :  { %211 = vst.msk [vmem:[#allocation3] sm:$0x3] %vm33_vm0, %v210_v39 }
  0xce   :  { %v217_v40 = vld [vmem:[#allocation3] sm:$0x3] }
  0xcf   :  { %510 = vmatmul.mubr.msk.f32.vlgmr.msra.gmra.mrb[0].mxu1 %vm223_vm6, %v217_v40 }
 0x194   :  { %v293_v42 = vpop.f32.mrb[0].mxu0 }
 0x195   :  { %v500_v43 = vpop.f32.mrb[1].mxu0  ;;  %v297_v30 = vmax.f32 %v293_v42, 0.0 }
 0x1a2   :  { %v367_v44 = vpop.f32.mrb[0].mxu1 }
 0x1a3   :  { %v371_v45 = vmax.f32 %v367_v44, 0.0  ;;  %v511_v46 = vpop.f32.mrb[1].mxu1 }
 0x1a5   :  { %v372_v47 = vadd.f32 %v371_v45, %v297_v30 }
 0x1a7   :  { %515 = vmatmul.mubr.msk.f32.vlgmr.msra.gmra.mrb[2].mxu0 %vm373_vm8, %v372_v47 }
 0x27a   :  { %v447_v48 = vpop.f32.mrb[2].mxu0 }
 0x27b   :  { %v477_v49 = vmul.f32 -1.442695, %v447_v48  ;;  %v516_v50 = vpop.f32.mrb[3].mxu0 }
 0x27d   :  { %537 = vpow2.f32 %v477_v49 }
 0x287   :  { %v538_v51 = vpop.eup %537 }
 0x288   :  { %v454_v52 = vadd.f32 1.0, %v538_v51 }
 0x28a   :  { %539 = vrcp.f32 %v454_v52 }
 0x294   :  { %v540_v53 = vpop.eup %539 }
 0x295   :  { %457 = vst.msk [vmem:[#allocation7] sm:$0x3] %vm33_vm0, %v540_v53 }
 0x296   :  { %574 = shalt.err (!%p571_p12)
}
 0x297   :  { %s575_s11 = scalar_lea.hbm %s688_s3, 32 }
 0x298   :  { %p576_p13 = scmp.ne.s32.totalorder %s688_s3, %s575_s11  ;;  %p579_p0 = scmp.lt.u32.totalorder %s575_s11, %s688_s3 }
 0x29a   :  { %p581_p1 = pnand %p579_p0, %p576_p13 }
 0x29c   :  { %584 = shalt.err (!%p581_p1)
}
 0x29d   :  { %467 = dma.vmem_to_hbm [thread:$0]  %s465_s2, 32, %s688_s3, [#allocation6]  }
 0x29e   :  { %587 = dma.done.wait [#allocation6], 32  }
 0x29f   :  { %588 = vsyncadd [#allocation6], 4294967264 }
 0x2a0   :  { %471 = vsyncpa [#allocation5], 1 }
 0x2a1   :  { %472 = vsyncpa [#allocation6], 1 }

</bundles_post_ra>
